<compile_context>
chip_gen: v5e
topology: v5e:2x2
jax: 0.10.0
libtpu: 0.0.40
codegen_flags: <defaults>
</compile_context>

<pallas_src>
import jax
import jax.numpy as jnp
from jax import lax
from jax.experimental import pallas as pl
from jax.experimental.pallas import tpu as pltpu

num_classes = 24


def _round_up(n, m):
    return ((n + m - 1) // m) * m


def _linear_kernel(x_ref, w_ref, b_ref, o_ref):
    # x_ref : (TB, E)  VMEM
    # w_ref : (C, E)   VMEM  (PyTorch nn.Linear layout, contracted on E directly)
    # b_ref : (1, C)   VMEM
    # o_ref : (TB, C)  VMEM
    acc = lax.dot_general(
        x_ref[...],
        w_ref[...],
        dimension_numbers=(((1,), (1,)), ((), ())),   # x[E] . w[E] -> (TB, C)
        preferred_element_type=jnp.float32,
    )
    o_ref[...] = (acc + b_ref[...].astype(jnp.float32)).astype(o_ref.dtype)


def classification_head(features, weight, bias, *, block_b=1024):
    """JAX wrapper mirroring ClassificationHead.forward.

    features: dict with key 'sentence_embedding' -> (B, E) array
    weight:   (C, E)  (PyTorch nn.Linear convention)
    bias:     (C,)
    returns:  (B, C)
    """
    x = features["sentence_embedding"]
    B, E = x.shape
    C = weight.shape[0]

    # Sublane-aligned batch tile: multiple of 8 for 32-bit, 16 for packed dtypes.
    sub = 8 if jnp.dtype(x.dtype).itemsize >= 4 else 16
    tb = min(_round_up(block_b, sub), _round_up(B, sub))

    # Pad batch to a whole number of tiles; slice result back afterwards.
    b_pad = _round_up(B, tb)
    x_in = jnp.pad(x, ((0, b_pad - B), (0, 0))) if b_pad != B else x

    b2 = bias.reshape(1, C)
    itemsize = jnp.dtype(x.dtype).itemsize

    cost = pl.CostEstimate(
        flops=2 * b_pad * E * C,
        transcendentals=0,
        bytes_accessed=(b_pad * E + C * E + C) * itemsize + b_pad * C * itemsize,
    )

    out = pl.pallas_call(
        _linear_kernel,
        out_shape=jax.ShapeDtypeStruct((b_pad, C), x.dtype),
        grid=(b_pad // tb,),
        in_specs=[
            pl.BlockSpec((tb, E), lambda i: (i, 0)),   # x: tiled over batch
            pl.BlockSpec((C, E), lambda i: (0, 0)),    # weight: resident
            pl.BlockSpec((1, C), lambda i: (0, 0)),    # bias: resident
        ],
        out_specs=pl.BlockSpec((tb, C), lambda i: (i, 0)),
        compiler_params=pltpu.CompilerParams(
            dimension_semantics=("parallel",),
        ),
        cost_estimate=cost,
    )(x_in, weight, b2)

    return out[:B] if b_pad != B else out


if __name__ == "__main__":
    key = jax.random.PRNGKey(0)
    k_x, k_w, k_b = jax.random.split(key, 3)

    batch = 8
    embedding_dim = 32

    # Deterministic "parameters" (synthetic init, nn.Linear shapes).
    weight = jax.random.normal(k_w, (num_classes, embedding_dim), jnp.float32) * 0.05
    bias = jax.random.normal(k_b, (num_classes,), jnp.float32) * 0.05

    x = jax.random.normal(k_x, (batch, embedding_dim), jnp.float32)
    features = {"sentence_embedding": x}

    out = classification_head(features, weight, bias)
    out = jax.block_until_ready(out)

    # Reference check against plain JAX (same math as nn.Linear).
    ref = x @ weight.T + bias
    assert out.shape == (batch, num_classes)
    assert jnp.allclose(out, ref, atol=1e-5, rtol=1e-5)

    # Also exercise a larger, non-tile-aligned batch to validate the batch grid.
    big_b = 1000
    xb = jax.random.normal(k_x, (big_b, embedding_dim), jnp.float32)
    out_b = jax.block_until_ready(
        classification_head({"sentence_embedding": xb}, weight, bias)
    )
    ref_b = xb @ weight.T + bias
    assert out_b.shape == (big_b, num_classes)
    assert jnp.allclose(out_b, ref_b, atol=1e-5, rtol=1e-5)

    print("KERNEL_OK")
</pallas_src>

<mosaic_0001>
module attributes {stable_mosaic.version = 11 : i64} {
  func.func @_linear_kernel(%arg0: i32, %arg1: memref<8x32xf32, #tpu.memory_space<vmem>>, %arg2: memref<24x32xf32, #tpu.memory_space<vmem>>, %arg3: memref<1x24xf32, #tpu.memory_space<vmem>>, %arg4: memref<8x24xf32, #tpu.memory_space<vmem>>) attributes {dimension_semantics = [#tpu.dimension_semantics<parallel>], iteration_bounds = array<i64: 1>, scalar_prefetch = 0 : i64, scratch_operands = 0 : i64, tpu.core_type = #tpu.core_type<tc>, window_params = [{transform_indices = @transform_0, window_bounds = array<i64: 8, 32>}, {pipeline_mode = #tpu.pipeline_mode<synchronous>, transform_indices = @transform_1, window_bounds = array<i64: 24, 32>}, {pipeline_mode = #tpu.pipeline_mode<synchronous>, transform_indices = @transform_2, window_bounds = array<i64: 1, 24>}, {transform_indices = @transform_3, window_bounds = array<i64: 8, 24>}]} {
    %c0 = arith.constant 0 : index
    %c0_0 = arith.constant 0 : index
    %0 = vector.load %arg1[%c0, %c0_0] : memref<8x32xf32, #tpu.memory_space<vmem>>, vector<8x32xf32>
    %c0_1 = arith.constant 0 : index
    %c0_2 = arith.constant 0 : index
    %1 = vector.load %arg2[%c0_1, %c0_2] : memref<24x32xf32, #tpu.memory_space<vmem>>, vector<24x32xf32>
    %cst = arith.constant dense<0.000000e+00> : vector<8x24xf32>
    %2 = tpu.matmul %0, %1, %cst {dimension_numbers = #tpu.dot_dimension_numbers<[1], [1], [0], [0], [0, 0, 1, 0], [], []>} : vector<8x32xf32>, vector<24x32xf32>, vector<8x24xf32> -> vector<8x24xf32>
    %c0_3 = arith.constant 0 : index
    %c0_4 = arith.constant 0 : index
    %3 = vector.load %arg3[%c0_3, %c0_4] : memref<1x24xf32, #tpu.memory_space<vmem>>, vector<1x24xf32>
    %4 = vector.broadcast %3 : vector<1x24xf32> to vector<8x24xf32>
    %5 = arith.addf %2, %4 : vector<8x24xf32>
    %c0_5 = arith.constant 0 : index
    %c0_6 = arith.constant 0 : index
    %6 = vector.load %arg4[%c0_5, %c0_6] : memref<8x24xf32, #tpu.memory_space<vmem>>, vector<8x24xf32>
    tpu.vector_store %arg4[%c0_5, %c0_6], %5 {strides = array<i32>} : memref<8x24xf32, #tpu.memory_space<vmem>>, vector<8x24xf32>,
    return
  }
  func.func @transform_0(%arg0: i32) -> (i32, i32) {
    %c0_i32 = arith.constant 0 : i32
    %c0_i32_0 = arith.constant 0 : i32
    return %arg0, %c0_i32 : i32, i32
  }
  func.func @transform_1(%arg0: i32) -> (i32, i32) {
    %c0_i32 = arith.constant 0 : i32
    %c0_i32_0 = arith.constant 0 : i32
    %c0_i32_1 = arith.constant 0 : i32
    return %c0_i32, %c0_i32_0 : i32, i32
  }
  func.func @transform_2(%arg0: i32) -> (i32, i32) {
    %c0_i32 = arith.constant 0 : i32
    %c0_i32_0 = arith.constant 0 : i32
    %c0_i32_1 = arith.constant 0 : i32
    return %c0_i32, %c0_i32_0 : i32, i32
  }
  func.func @transform_3(%arg0: i32) -> (i32, i32) {
    %c0_i32 = arith.constant 0 : i32
    %c0_i32_0 = arith.constant 0 : i32
    return %arg0, %c0_i32 : i32, i32
  }
}

</mosaic_0001>

<bundles_post_ra>
// kernel: tpu_custom_call.1
= control target key start
LH: loop header
LB: loop body
LE: loop exit
PB: predicated region body
PF: predicated region fallthrough
CT: control target
= control target key end

     0   :  { %8 = vsyncpa [#allocation3], 0  ;;  %s231_s0 = inlined_call_operand.hbm [shape: f32[8,32], index: 0, kind: input, shape index: {}]   ;;  %s232_s1 = inlined_call_operand.hbm [shape: f32[24,32], index: 1, kind: input, shape index: {}]   ;;  %s233_s2 = inlined_call_operand.vmem [shape: f32[1,24], index: 2, kind: input, shape index: {}]   ;;  %s234_s3 = inlined_call_operand.hbm [shape: f32[8,24], index: 3, kind: output, shape index: {}]  }
   0x1   :  { %9 = vsyncpa [#allocation6], 0 }
   0x2   :  { %10 = vsyncpa [#allocation4], 0  ;;  %s16_s14 = sshll.u32 %s231_s0, 4  ;;  %s194_s15 = smov [#allocation2]   ;;  %s17_s14 = int_to_ptr.hbm [resolvable:$true] %s16_s14 }
   0x3   :  { %s18_s16 = sshll.u32 %s194_s15, 4  ;;  %s26_s19 = sshll.u32 %s232_s1, 4  ;;  %s19_s16 = int_to_ptr.vmem [resolvable:$true] %s18_s16  ;;  %s27_s19 = int_to_ptr.hbm [resolvable:$true] %s26_s19 }
   0x4   :  { %21 = dma.hbm_to_vmem [thread:$0]  %s17_s14, 128, %s19_s16, [#allocation3]  }
   0x5   :  { %s195_s20 = smov [#allocation5]   ;;  %s196_s22 = smov 128  }
   0x6   :  { %s28_s21 = sshll.u32 %s195_s20, 4  ;;  %s197_s23 = smov 8   ;;  %s29_s21 = int_to_ptr.vmem [resolvable:$true] %s28_s21 }
   0x7   :  { %34 = dma.hbm_to_vmem [thread:$0]  %s27_s19, 384, %s29_s21, [#allocation6], %s196_s22, %s196_s22, %s197_s23  }
   0x8   :  { %188 = dma.done.wait [#allocation3], 128  }
   0x9   :  { %189 = vsyncadd [#allocation3], 4294967168 }
   0xa   :  { %190 = dma.done.wait [#allocation6], 384  }
   0xb   :  { %191 = vsyncadd [#allocation6], 4294966912  ;;  %vm53_vm0 = vcmask 261120   ;;  %v48_v0 = vld [vmem:[#allocation5 + $0x10] sm:$0xff]  ;;  %v47_v1 = vld [vmem:[#allocation5 + $0x8] sm:$0xff]  ;;  %s198_s24 = smov [#allocation7]  }
   0xc   :  { %106 = vmatpush.xpose.msk.msra.mxu0 %vm53_vm0, %v48_v0  ;;  %v46_v2 = vld [vmem:[#allocation5] sm:$0xff]  ;;  %v45_v3 = vld [vmem:[#allocation2] sm:$0xff]  ;;  %s93_s25 = sshll.u32 %s198_s24, 4  ;;  %s95_s28 = sshll.u32 %s234_s3, 4  ;;  %vm86_vm1 = vcmask 195584   ;;  %s94_s25 = int_to_ptr.vmem [resolvable:$true] %s93_s25  ;;  %s96_s28 = int_to_ptr.hbm [resolvable:$true] %s95_s28 }
   0xd   :  { %v115_v4 = vld [vmem:[%s233_s2] ss:$0 sm:$0xff] }
  0x10   :  { %107 = vmatpush.xpose.msk.msra.mxu0 %vm53_vm0, %v47_v1 }
  0x14   :  { %108 = vmatpush.xpose.msk.msra.mxu0 %vm53_vm0, %v46_v2 }
  0x17   :  { %109 = vmatmul.msk.f32.vlgmr.msra.gmra.mxu0 %vm53_vm0, %v45_v3 }
  0x94   :  { %v83_v5 = vpop.f32.mrf.mxu0 }
  0x95   :  { %v84_v6 = vadd.f32 %v115_v4, %v83_v5 }
  0x97   :  { %87 = vst.msk [vmem:[#allocation7] sm:$0xff] %vm86_vm1, %v84_v6 }
  0x98   :  { %98 = dma.vmem_to_hbm [thread:$0]  %s94_s25, 128, %s96_s28, [#allocation4]  }
  0x99   :  { %192 = dma.done.wait [#allocation4], 128  }
  0x9a   :  { %193 = vsyncadd [#allocation4], 4294967168 }
  0x9b   :  { %103 = vsyncpa [#allocation3], 1 }
  0x9c   :  { %104 = vsyncpa [#allocation6], 1 }
  0x9d   :  { %105 = vsyncpa [#allocation4], 1 }

</bundles_post_ra>
